<compile_context>
chip_gen: v7x
topology: tpu7x:2x2x1
jax: 0.10.0
libtpu: 0.0.40
codegen_flags: <defaults>
</compile_context>

<pallas_src>
import math

import jax
import jax.numpy as jnp
from jax.experimental import pallas as pl
from jax.experimental.pallas import tpu as pltpu

_SUB = 8      # sublane granularity
_LANE = 128   # lane granularity


def _coil_combine_kernel(sr_ref, si_ref, imr_ref, imi_ref, out_r_ref, out_i_ref):
    # input blocks: (bp, C, tp)   output blocks: (bp, tp)
    # conj(sens) * im = (sr - i*si) * (xr + i*xi)
    #                 = (sr*xr + si*xi) + i*(sr*xi - si*xr)
    # Unrolled accumulation over the coil (sublane) axis: keeps only two
    # (bp, tp) accumulators live and does the reduction with plain VPU adds
    # instead of a cross-sublane XLU reduce over a (bp, C, tp) temporary.
    C = sr_ref.shape[1]
    acc_r = jnp.zeros(out_r_ref.shape, jnp.float32)
    acc_i = jnp.zeros(out_i_ref.shape, jnp.float32)
    for c in range(C):          # static unroll; C is known from the block shape
        sr = sr_ref[:, c, :]
        si = si_ref[:, c, :]
        xr = imr_ref[:, c, :]
        xi = imi_ref[:, c, :]
        acc_r = acc_r + (sr * xr + si * xi)
        acc_i = acc_i + (sr * xi - si * xr)
    out_r_ref[...] = acc_r
    out_i_ref[...] = acc_i


def _select_tiles(pre, C, post):
    """Pick (bp, tp) block sizes and the grid, budgeted against VMEM."""
    c_pad = -(-C // _SUB) * _SUB
    budget = 20 * 1024 * 1024            # double-buffered VMEM footprint target
    # bytes per (bp=1, tp=1) cell: 4 f32 input blocks + 2 f32 output blocks, x2 bufs
    per_cell = 4 * (4 * 2 * c_pad + 2 * 2)

    # -- bp: start at 8 (or full pre), per the (8,128) rule for the output block
    bp = pre if pre < _SUB else _SUB

    # -- tp: largest lane-aligned tile that fits the budget at this bp
    tp_budget = budget // (per_cell * bp)
    tp_budget = max(_LANE, (tp_budget // _LANE) * _LANE)
    if post <= _LANE:
        tp = post                                     # full extent
    elif post % _LANE == 0:
        tp = min(post, tp_budget)
    else:
        # lane-dense bulk tiles + one masked ragged-tail step
        tp = min((post // _LANE) * _LANE, tp_budget)

    # -- co-select bp: when post is small, grow bp (multiples of 8 or full pre)
    #    so the per-step DMA stays large vs. the ~0.35us fixed step overhead.
    if bp < pre:
        bp_budget = budget // (per_cell * tp)
        if bp_budget >= pre:
            bp = pre
        elif bp_budget >= _SUB:
            bp = (bp_budget // _SUB) * _SUB

    # -- guarantee >= 2 grid steps: feeds both v7x TensorCores ("parallel"
    #    axes) and lets the pipeline overlap DMA of tile i+1 with compute of i.
    grid_pre, grid_post = pl.cdiv(pre, bp), pl.cdiv(post, tp)
    if grid_pre * grid_post < 2:
        if tp > _LANE:
            tp = max(_LANE, (-(-tp // (2 * _LANE))) * _LANE)   # ~half, 128-aligned
        elif bp > _SUB:
            bp = max(_SUB, ((bp // 2) // _SUB) * _SUB)
        grid_pre, grid_post = pl.cdiv(pre, bp), pl.cdiv(post, tp)

    return bp, tp, (grid_pre, grid_post)


def coil_combine_planar(im_r, im_i, sens_r, sens_i, dim=2):
    """Core Pallas op on split real/imag planes (the preferred upstream layout).

    All four inputs share the same shape; returns (out_r, out_i) with the coil
    axis `dim` summed out.
    """
    shape = im_r.shape
    ndim = im_r.ndim
    dim = dim % ndim
    pre = math.prod(shape[:dim])
    C = shape[dim]
    post = math.prod(shape[dim + 1:])
    res_shape = shape[:dim] + shape[dim + 1:]

    f32 = jnp.float32
    planes = [x.astype(f32).reshape(pre, C, post)
              for x in (sens_r, sens_i, im_r, im_i)]

    bp, tp, grid = _select_tiles(pre, C, post)

    in_spec = pl.BlockSpec((bp, C, tp), lambda i, j: (i, 0, j))
    out_spec = pl.BlockSpec((bp, tp), lambda i, j: (i, j))

    n_in = pre * C * post
    cost = pl.CostEstimate(
        flops=8 * n_in,                               # 4 mul + 4 add per coil elem
        transcendentals=0,
        bytes_accessed=4 * 4 * n_in + 2 * 4 * pre * post,
    )

    out_r, out_i = pl.pallas_call(
        _coil_combine_kernel,
        out_shape=(
            jax.ShapeDtypeStruct((pre, post), f32),
            jax.ShapeDtypeStruct((pre, post), f32),
        ),
        grid=grid,
        in_specs=[in_spec, in_spec, in_spec, in_spec],
        out_specs=(out_spec, out_spec),
        compiler_params=pltpu.CompilerParams(
            dimension_semantics=("parallel", "parallel"),
            vmem_limit_bytes=48 * 1024 * 1024,
            allow_input_fusion=[True, True, True, True],
        ),
        cost_estimate=cost,
    )(*planes)

    return out_r.reshape(res_shape), out_i.reshape(res_shape)


def coil_combine(im, sens, dim=2):
    """Pallas equivalent of CoilCombine(dim).forward(im, sens) (complex I/O)."""
    assert im.shape == sens.shape, "im and sens must have the same shape"
    # TODO(synk): complex128 inputs are computed at f32 precision (Mosaic has no
    # f64/complex path); feed split real/imag planes to coil_combine_planar
    # upstream if a different precision policy is needed.
    im_c = im.astype(jnp.complex64)
    sens_c = sens.astype(jnp.complex64)
    # Mosaic has no complex dtype and XLA's bitcast-convert rejects complex, so
    # a real/imag split is unavoidable at a complex-array interface; it is
    # marked fusible into the kernel operands (allow_input_fusion).  The zero-
    # copy fix is to keep planar data upstream and call coil_combine_planar.
    out_r, out_i = coil_combine_planar(
        jnp.real(im_c), jnp.imag(im_c), jnp.real(sens_c), jnp.imag(sens_c), dim=dim
    )
    return jax.lax.complex(out_r, out_i)


if __name__ == "__main__":
    key = jax.random.PRNGKey(0)

    # Shapes consistent with the module: (batch, frames, coils, H, W), dim=2.
    B, M, C, H, W = 2, 2, 4, 16, 16
    k1, k2, k3, k4 = jax.random.split(key, 4)
    im = jax.lax.complex(
        jax.random.normal(k1, (B, M, C, H, W), jnp.float32),
        jax.random.normal(k2, (B, M, C, H, W), jnp.float32),
    )
    sens = jax.lax.complex(
        jax.random.normal(k3, (B, M, C, H, W), jnp.float32),
        jax.random.normal(k4, (B, M, C, H, W), jnp.float32),
    )

    out = coil_combine(im, sens, dim=2)
    out = jax.block_until_ready(out)

    ref = jnp.sum(jnp.conj(sens) * im, axis=2)
    assert out.shape == (B, M, H, W)
    assert out.dtype == jnp.complex64
    assert jnp.allclose(out, ref, atol=1e-4, rtol=1e-4), "mismatch vs reference"

    # Second, ragged shape: exercises the masked post tail (324 = 2*128 + 68),
    # coil-axis sublane padding (C=3), and the co-selected bp=full-pre path.
    B2, M2, C2, H2, W2 = 3, 5, 3, 18, 18
    j1, j2, j3, j4 = jax.random.split(jax.random.PRNGKey(1), 4)
    im2 = jax.lax.complex(
        jax.random.normal(j1, (B2, M2, C2, H2, W2), jnp.float32),
        jax.random.normal(j2, (B2, M2, C2, H2, W2), jnp.float32),
    )
    sens2 = jax.lax.complex(
        jax.random.normal(j3, (B2, M2, C2, H2, W2), jnp.float32),
        jax.random.normal(j4, (B2, M2, C2, H2, W2), jnp.float32),
    )
    out2 = jax.block_until_ready(coil_combine(im2, sens2, dim=2))
    ref2 = jnp.sum(jnp.conj(sens2) * im2, axis=2)
    assert out2.shape == (B2, M2, H2, W2)
    assert jnp.allclose(out2, ref2, atol=1e-4, rtol=1e-4), "mismatch (ragged shape)"

    print("KERNEL_OK")
</pallas_src>

<mosaic_0001>
module attributes {stable_mosaic.version = 11 : i64} {
  func.func @_coil_combine_kernel(%arg0: i32, %arg1: i32, %arg2: memref<4x4x128xf32, #tpu.memory_space<vmem>>, %arg3: memref<4x4x128xf32, #tpu.memory_space<vmem>>, %arg4: memref<4x4x128xf32, #tpu.memory_space<vmem>>, %arg5: memref<4x4x128xf32, #tpu.memory_space<vmem>>, %arg6: memref<4x128xf32, #tpu.memory_space<vmem>>, %arg7: memref<4x128xf32, #tpu.memory_space<vmem>>) attributes {dimension_semantics = [#tpu.dimension_semantics<parallel>, #tpu.dimension_semantics<parallel>], iteration_bounds = array<i64: 1, 2>, scalar_prefetch = 0 : i64, scratch_operands = 0 : i64, tpu.core_type = #tpu.core_type<tc>, window_params = [{transform_indices = @transform_0, window_bounds = array<i64: 4, 4, 128>}, {transform_indices = @transform_1, window_bounds = array<i64: 4, 4, 128>}, {transform_indices = @transform_2, window_bounds = array<i64: 4, 4, 128>}, {transform_indices = @transform_3, window_bounds = array<i64: 4, 4, 128>}, {transform_indices = @transform_4, window_bounds = array<i64: 4, 128>}, {transform_indices = @transform_5, window_bounds = array<i64: 4, 128>}]} {
    %cst = arith.constant 0.000000e+00 : f32
    %0 = vector.broadcast %cst : f32 to vector<4x128xf32>
    %cst_0 = arith.constant 0.000000e+00 : f32
    %1 = vector.broadcast %cst_0 : f32 to vector<4x128xf32>
    %c0 = arith.constant 0 : index
    %c0_1 = arith.constant 0 : index
    %c0_2 = arith.constant 0 : index
    %2 = vector.load %arg2[%c0, %c0_1, %c0_2] : memref<4x4x128xf32, #tpu.memory_space<vmem>>, vector<4x1x128xf32>
    %3 = vector.shape_cast %2 : vector<4x1x128xf32> to vector<4x128xf32>
    %c0_3 = arith.constant 0 : index
    %c0_4 = arith.constant 0 : index
    %c0_5 = arith.constant 0 : index
    %4 = vector.load %arg3[%c0_3, %c0_4, %c0_5] : memref<4x4x128xf32, #tpu.memory_space<vmem>>, vector<4x1x128xf32>
    %5 = vector.shape_cast %4 : vector<4x1x128xf32> to vector<4x128xf32>
    %c0_6 = arith.constant 0 : index
    %c0_7 = arith.constant 0 : index
    %c0_8 = arith.constant 0 : index
    %6 = vector.load %arg4[%c0_6, %c0_7, %c0_8] : memref<4x4x128xf32, #tpu.memory_space<vmem>>, vector<4x1x128xf32>
    %7 = vector.shape_cast %6 : vector<4x1x128xf32> to vector<4x128xf32>
    %c0_9 = arith.constant 0 : index
    %c0_10 = arith.constant 0 : index
    %c0_11 = arith.constant 0 : index
    %8 = vector.load %arg5[%c0_9, %c0_10, %c0_11] : memref<4x4x128xf32, #tpu.memory_space<vmem>>, vector<4x1x128xf32>
    %9 = vector.shape_cast %8 : vector<4x1x128xf32> to vector<4x128xf32>
    %10 = arith.mulf %3, %7 : vector<4x128xf32>
    %11 = arith.mulf %5, %9 : vector<4x128xf32>
    %12 = arith.addf %10, %11 : vector<4x128xf32>
    %13 = arith.addf %0, %12 : vector<4x128xf32>
    %14 = arith.mulf %3, %9 : vector<4x128xf32>
    %15 = arith.mulf %5, %7 : vector<4x128xf32>
    %16 = arith.subf %14, %15 : vector<4x128xf32>
    %17 = arith.addf %1, %16 : vector<4x128xf32>
    %c0_12 = arith.constant 0 : index
    %c1 = arith.constant 1 : index
    %c0_13 = arith.constant 0 : index
    %18 = vector.load %arg2[%c0_12, %c1, %c0_13] : memref<4x4x128xf32, #tpu.memory_space<vmem>>, vector<4x1x128xf32>
    %19 = vector.shape_cast %18 : vector<4x1x128xf32> to vector<4x128xf32>
    %c0_14 = arith.constant 0 : index
    %c1_15 = arith.constant 1 : index
    %c0_16 = arith.constant 0 : index
    %20 = vector.load %arg3[%c0_14, %c1_15, %c0_16] : memref<4x4x128xf32, #tpu.memory_space<vmem>>, vector<4x1x128xf32>
    %21 = vector.shape_cast %20 : vector<4x1x128xf32> to vector<4x128xf32>
    %c0_17 = arith.constant 0 : index
    %c1_18 = arith.constant 1 : index
    %c0_19 = arith.constant 0 : index
    %22 = vector.load %arg4[%c0_17, %c1_18, %c0_19] : memref<4x4x128xf32, #tpu.memory_space<vmem>>, vector<4x1x128xf32>
    %23 = vector.shape_cast %22 : vector<4x1x128xf32> to vector<4x128xf32>
    %c0_20 = arith.constant 0 : index
    %c1_21 = arith.constant 1 : index
    %c0_22 = arith.constant 0 : index
    %24 = vector.load %arg5[%c0_20, %c1_21, %c0_22] : memref<4x4x128xf32, #tpu.memory_space<vmem>>, vector<4x1x128xf32>
    %25 = vector.shape_cast %24 : vector<4x1x128xf32> to vector<4x128xf32>
    %26 = arith.mulf %19, %23 : vector<4x128xf32>
    %27 = arith.mulf %21, %25 : vector<4x128xf32>
    %28 = arith.addf %26, %27 : vector<4x128xf32>
    %29 = arith.addf %13, %28 : vector<4x128xf32>
    %30 = arith.mulf %19, %25 : vector<4x128xf32>
    %31 = arith.mulf %21, %23 : vector<4x128xf32>
    %32 = arith.subf %30, %31 : vector<4x128xf32>
    %33 = arith.addf %17, %32 : vector<4x128xf32>
    %c0_23 = arith.constant 0 : index
    %c2 = arith.constant 2 : index
    %c0_24 = arith.constant 0 : index
    %34 = vector.load %arg2[%c0_23, %c2, %c0_24] : memref<4x4x128xf32, #tpu.memory_space<vmem>>, vector<4x1x128xf32>
    %35 = vector.shape_cast %34 : vector<4x1x128xf32> to vector<4x128xf32>
    %c0_25 = arith.constant 0 : index
    %c2_26 = arith.constant 2 : index
    %c0_27 = arith.constant 0 : index
    %36 = vector.load %arg3[%c0_25, %c2_26, %c0_27] : memref<4x4x128xf32, #tpu.memory_space<vmem>>, vector<4x1x128xf32>
    %37 = vector.shape_cast %36 : vector<4x1x128xf32> to vector<4x128xf32>
    %c0_28 = arith.constant 0 : index
    %c2_29 = arith.constant 2 : index
    %c0_30 = arith.constant 0 : index
    %38 = vector.load %arg4[%c0_28, %c2_29, %c0_30] : memref<4x4x128xf32, #tpu.memory_space<vmem>>, vector<4x1x128xf32>
    %39 = vector.shape_cast %38 : vector<4x1x128xf32> to vector<4x128xf32>
    %c0_31 = arith.constant 0 : index
    %c2_32 = arith.constant 2 : index
    %c0_33 = arith.constant 0 : index
    %40 = vector.load %arg5[%c0_31, %c2_32, %c0_33] : memref<4x4x128xf32, #tpu.memory_space<vmem>>, vector<4x1x128xf32>
    %41 = vector.shape_cast %40 : vector<4x1x128xf32> to vector<4x128xf32>
    %42 = arith.mulf %35, %39 : vector<4x128xf32>
    %43 = arith.mulf %37, %41 : vector<4x128xf32>
    %44 = arith.addf %42, %43 : vector<4x128xf32>
    %45 = arith.addf %29, %44 : vector<4x128xf32>
    %46 = arith.mulf %35, %41 : vector<4x128xf32>
    %47 = arith.mulf %37, %39 : vector<4x128xf32>
    %48 = arith.subf %46, %47 : vector<4x128xf32>
    %49 = arith.addf %33, %48 : vector<4x128xf32>
    %c0_34 = arith.constant 0 : index
    %c3 = arith.constant 3 : index
    %c0_35 = arith.constant 0 : index
    %50 = vector.load %arg2[%c0_34, %c3, %c0_35] : memref<4x4x128xf32, #tpu.memory_space<vmem>>, vector<4x1x128xf32>
    %51 = vector.shape_cast %50 : vector<4x1x128xf32> to vector<4x128xf32>
    %c0_36 = arith.constant 0 : index
    %c3_37 = arith.constant 3 : index
    %c0_38 = arith.constant 0 : index
    %52 = vector.load %arg3[%c0_36, %c3_37, %c0_38] : memref<4x4x128xf32, #tpu.memory_space<vmem>>, vector<4x1x128xf32>
    %53 = vector.shape_cast %52 : vector<4x1x128xf32> to vector<4x128xf32>
    %c0_39 = arith.constant 0 : index
    %c3_40 = arith.constant 3 : index
    %c0_41 = arith.constant 0 : index
    %54 = vector.load %arg4[%c0_39, %c3_40, %c0_41] : memref<4x4x128xf32, #tpu.memory_space<vmem>>, vector<4x1x128xf32>
    %55 = vector.shape_cast %54 : vector<4x1x128xf32> to vector<4x128xf32>
    %c0_42 = arith.constant 0 : index
    %c3_43 = arith.constant 3 : index
    %c0_44 = arith.constant 0 : index
    %56 = vector.load %arg5[%c0_42, %c3_43, %c0_44] : memref<4x4x128xf32, #tpu.memory_space<vmem>>, vector<4x1x128xf32>
    %57 = vector.shape_cast %56 : vector<4x1x128xf32> to vector<4x128xf32>
    %58 = arith.mulf %51, %55 : vector<4x128xf32>
    %59 = arith.mulf %53, %57 : vector<4x128xf32>
    %60 = arith.addf %58, %59 : vector<4x128xf32>
    %61 = arith.addf %45, %60 : vector<4x128xf32>
    %62 = arith.mulf %51, %57 : vector<4x128xf32>
    %63 = arith.mulf %53, %55 : vector<4x128xf32>
    %64 = arith.subf %62, %63 : vector<4x128xf32>
    %65 = arith.addf %49, %64 : vector<4x128xf32>
    %c0_45 = arith.constant 0 : index
    %c0_46 = arith.constant 0 : index
    %66 = vector.load %arg6[%c0_45, %c0_46] : memref<4x128xf32, #tpu.memory_space<vmem>>, vector<4x128xf32>
    tpu.vector_store %arg6[%c0_45, %c0_46], %61 {strides = array<i32>} : memref<4x128xf32, #tpu.memory_space<vmem>>, vector<4x128xf32>,
    %c0_47 = arith.constant 0 : index
    %c0_48 = arith.constant 0 : index
    %67 = vector.load %arg7[%c0_47, %c0_48] : memref<4x128xf32, #tpu.memory_space<vmem>>, vector<4x128xf32>
    tpu.vector_store %arg7[%c0_47, %c0_48], %65 {strides = array<i32>} : memref<4x128xf32, #tpu.memory_space<vmem>>, vector<4x128xf32>,
    return
  }
  func.func @transform_0(%arg0: i32, %arg1: i32) -> (i32, i32, i32) {
    %c0_i32 = arith.constant 0 : i32
    %c0_i32_0 = arith.constant 0 : i32
    return %arg0, %c0_i32, %arg1 : i32, i32, i32
  }
  func.func @transform_1(%arg0: i32, %arg1: i32) -> (i32, i32, i32) {
    %c0_i32 = arith.constant 0 : i32
    %c0_i32_0 = arith.constant 0 : i32
    return %arg0, %c0_i32, %arg1 : i32, i32, i32
  }
  func.func @transform_2(%arg0: i32, %arg1: i32) -> (i32, i32, i32) {
    %c0_i32 = arith.constant 0 : i32
    %c0_i32_0 = arith.constant 0 : i32
    return %arg0, %c0_i32, %arg1 : i32, i32, i32
  }
  func.func @transform_3(%arg0: i32, %arg1: i32) -> (i32, i32, i32) {
    %c0_i32 = arith.constant 0 : i32
    %c0_i32_0 = arith.constant 0 : i32
    return %arg0, %c0_i32, %arg1 : i32, i32, i32
  }
  func.func @transform_4(%arg0: i32, %arg1: i32) -> (i32, i32) {
    %c0_i32 = arith.constant 0 : i32
    return %arg0, %arg1 : i32, i32
  }
  func.func @transform_5(%arg0: i32, %arg1: i32) -> (i32, i32) {
    %c0_i32 = arith.constant 0 : i32
    return %arg0, %arg1 : i32, i32
  }
}

</mosaic_0001>

<bundles_post_ra>
// kernel: tpu_custom_call.1
= control target key start
LH: loop header
LB: loop body
LE: loop exit
PB: predicated region body
PF: predicated region fallthrough
CT: control target
= control target key end

     0   :  { %s1829_s0 = inlined_call_operand.hbm [shape: f32[4,4,256], index: 0, kind: input, shape index: {}]   ;;  %s1830_s1 = inlined_call_operand.hbm [shape: f32[4,4,256], index: 1, kind: input, shape index: {}]   ;;  %s1831_s2 = inlined_call_operand.hbm [shape: f32[4,4,256], index: 2, kind: input, shape index: {}]   ;;  %s1832_s3 = inlined_call_operand.hbm [shape: f32[4,4,256], index: 3, kind: input, shape index: {}]   ;;  %s1833_s4 = inlined_call_operand.hbm [shape: f32[4,256], index: 4, kind: output, shape index: {0}]   ;;  %s1834_s5 = inlined_call_operand.hbm [shape: f32[4,256], index: 5, kind: output, shape index: {1}]  }
   0x1   :  { %1851 = sst [smem:[#allocation26_spill]] %s1829_s0 }
   0x2   :  { %1852 = sst [smem:[#allocation27_spill]] %s1830_s1 }
   0x3   :  { %11 = vsyncpa [#allocation3], 0 }
   0x4   :  { %13 = vsyncpa [#allocation3 + $0x1], 0 }
   0x5   :  { %14 = vsyncpa [#allocation6], 0 }
   0x6   :  { %16 = vsyncpa [#allocation6 + $0x1], 0 }
   0x7   :  { %17 = vsyncpa [#allocation9], 0 }
   0x8   :  { %19 = vsyncpa [#allocation9 + $0x1], 0 }
   0x9   :  { %20 = vsyncpa [#allocation4], 0 }
   0xa   :  { %22 = vsyncpa [#allocation4 + $0x1], 0 }
   0xb   :  { %23 = vsyncpa [#allocation12], 0 }
   0xc   :  { %25 = vsyncpa [#allocation12 + $0x1], 0  ;;  %s1243_s18 = smov 0   ;;  %s1245_s19 = smov 0  }
   0xd   :  { %s1247_s20 = smov 0   ;;  %s1249_s21 = smov 0  }
   0xe   :  { %s1251_s22 = smov 0   ;;  %s1253_s23 = smov 0  }
   0xf LB: > { %1853 = sst [smem:[#allocation18_spill]] %s1190_s20  ;;  %s1274_s24 = sadd.s32 4294967295, %s1202_s23   ;;  %s1202_s23 = sphi %s1253_s23, %s31_s23   ;;  %s1198_s22 = sphi %s1251_s22, %s1889_s22   ;;  %s1194_s21 = sphi %s1249_s21, %s1888_s21   ;;  %s1190_s20 = sphi %s1247_s20, %s1887_s20   ;;  %s1186_s19 = sphi %s1245_s19, %s1891_s19   ;;  %s1182_s18 = sphi %s1243_s18, %s1890_s18  }
  0x10   : > { %1854 = sst [smem:[#allocation19_spill]] %s1198_s22  ;;  %s851_s25 = sadd.s32 4294967294, %s1202_s23  }
  0x11   : > { %1855 = sst [smem:[#allocation20_spill]] %s1202_s23  ;;  %s40_s26 = sadd.s32 1, %s1198_s22 }
  0x12   : > { %s52_s27 = sadd.s32 1, %s1190_s20  ;;  %p41_p0 = scmp.ge.s32.totalorder %s40_s26, 2 }
  0x13   : > { %p59_p1 = scmp.ne.s32.totalorder %s1190_s20, %s1186_s19  ;;  %p60_p2 = scmp.eq.s32.totalorder %s1202_s23, 0 }
  0x14   : > { %p65_p3 = scmp.ne.s32.totalorder %s1186_s19, %s1182_s18  ;;  %s1893_s26 = smov (%p41_p0, %s40_s26), 0 }
  0x15   : > { %1856 = sst [smem:[#allocation21_spill]] %s1893_s26  ;;  %p1286_p4 = por %p60_p2, %p59_p1 }
  0x16   : > { %p66_p5 = scmp.eq.s32.totalorder %s1274_s24, 0  ;;  %s48_s29 = ssub.s32 %s1198_s22, %s1893_s26 }
  0x17   : > { %p175_p6 = scmp.eq.s32.totalorder %s1274_s24, 1  ;;  %p50_p7 = scmp.eq.s32.totalorder %s48_s29, 0 }
  0x18   : > { %p1294_p8 = por %p66_p5, %p65_p3  ;;  %p181_p10 = scmp.eq.s32.totalorder %s851_s25, 1 }
  0x19   : > { %p1298_p9 = por %p175_p6, %p59_p1  ;;  %p907_p13 = scmp.lt.s32.totalorder %s1202_s23, 2 }
  0x1a   : > { %s1858_s30 = scalar_select %p1294_p8, 1, 0 }
  0x1b   : > { %s1859_s6 = scalar_select %p1298_p9, 1, 0 }
  0x1c   : > { %s1303_s7 = scalar_select %p50_p7, %s1190_s20, %s52_s27  }
  0x1d   : > { %p1305_p11 = por %p181_p10, %p65_p3  ;;  %s1312_s9 = sand.u32 1, %s1190_s20  }
  0x1e   : > { %1860 = sst [smem:[#allocation22_spill]] %s1303_s7  ;;  %s1315_s10 = sshll.u32 %s1312_s9, 4 }
  0x1f   : > { %s1861_s8 = scalar_select %p1305_p11, 1, 0 }
  0x20   : > { %s1318_s11 = sshll.u32 %s1198_s22, 6  ;;  %p1322_p0 = pnand %p907_p13, %p1286_p4 }
  0x21   : > { %s252_s13 = sand.u32 1, %s1202_s23   ;;  %s1863_s1 = sld [smem:[#allocation27_spill]] }
  0x22   : > { %s256_s17 = scalar_lea.vmem [#allocation5], %s1315_s10  ;;  %s1337_s27 = scalar_lea.sflag [#allocation6], %s252_s13 }
  0x23   : > { %s265_s25 = sshll.u32 %s256_s17, 4  ;;  %p1343_p3 = pneg %p1322_p0  ;;  %s1334_s25 = int_to_ptr.vmem [resolvable:$true] %s265_s25 }
  0x27   : > { %s1331_s16 = scalar_lea.hbm %s1863_s1, %s1318_s11  ;;  %s965_s17 = scalar_lea.hbm %s1863_s1, 512 }
  0x28   : > { %s960_s28 = scalar_lea.hbm %s1331_s16, 256  ;;  %p966_p6 = scmp.lt.u32.totalorder %s1331_s16, %s1863_s1 }
  0x29   : > { %p961_p2 = scmp.ne.s32.totalorder %s1331_s16, %s960_s28  ;;  %p967_p7 = scmp.lt.u32.totalorder %s965_s17, %s960_s28 }
  0x2a   : > { %p969_p13 = scmp.lt.u32.totalorder %s960_s28, %s1331_s16 }
  0x2b   : > { %p963_p4 = pnand %p1343_p3, %p961_p2  ;;  %p968_p10 = por %p967_p7, %p966_p6 }
  0x2d   : > { %p964_p5 = pneg %p963_p4  ;;  %p970_p12 = por %p969_p13, %p968_p10 }
  0x2f   : > { %p971_p1 = pnand %p970_p12, %p964_p5 }
  0x31   : > { %974 = shalt.err (!%p971_p1)
}
  0x32   : > { %s975_s13 = scalar_lea.vmem %s1334_s25, 256  ;;  %s1204_s14 = smov [#allocation5]  }
  0x33   : > { %p976_p2 = scmp.ne.s32.totalorder %s1334_s25, %s975_s13  ;;  %s980_s15 = sshll.u32 %s1204_s14, 4  ;;  %s981_s15 = int_to_ptr.vmem [resolvable:$false] %s980_s15 }
  0x34   : > { %s982_s22 = scalar_lea.vmem %s981_s15, 512  ;;  %p983_p9 = scmp.lt.s32.totalorder %s1334_s25, %s981_s15 }
  0x35   : > { %p978_p4 = pnand %p976_p2, %p1343_p3  ;;  %p984_p8 = scmp.lt.s32.totalorder %s982_s22, %s975_s13 }
  0x37   : > { %p979_p11 = pneg %p978_p4  ;;  %p985_p6 = por %p984_p8, %p983_p9 }
  0x39   : > { %p986_p7 = pnand %p985_p6, %p979_p11 }
  0x3b   : > { %989 = shalt.err (!%p986_p7)
}
  0x3c   : > { %s1839_s26 = smov 128   ;;  %s1841_s28 = smov 64  }
  0x3d   : > { %s1843_s17 = smov 4   ;;  %p319_p8 = scmp.lt.s32.totalorder %s1202_s23, 3 }
  0x3e   : > { %893 = dma.hbm_to_vmem [thread:$0]  (!%p1322_p0), %s1331_s16, 256, %s1334_s25, %s1337_s27, %s1839_s26, %s1841_s28, %s1843_s17  }
  0x3f   : > { %p1865_p9 = scmp.ge.s32.totalorder %s1202_s23, 1  ;;  %s1867_s0 = sld [smem:[#allocation26_spill]] }
  0x40   : > { %s233_s1 = scalar_lea.vmem [#allocation2], %s1315_s10  ;;  %s230_s16 = scalar_lea.sflag [#allocation3], %s1312_s9 }
  0x41   : > { %p1373_p11 = pnand %p1865_p9, %p319_p8  ;;  %s242_s7 = sshll.u32 %s233_s1, 4  ;;  %s1384_s7 = int_to_ptr.vmem [resolvable:$true] %s242_s7 }
  0x43   : > { %s1866_s13 = scalar_select %p1373_p11, 1, 0 }
  0x45   : > { %s1381_s22 = scalar_lea.hbm %s1867_s0, %s1318_s11  ;;  %s995_s14 = scalar_lea.hbm %s1867_s0, 512 }
  0x46   : > { %s990_s25 = scalar_lea.hbm %s1381_s22, 256  ;;  %p996_p10 = scmp.lt.u32.totalorder %s1381_s22, %s1867_s0 }
  0x47   : > { %p991_p12 = scmp.ne.s32.totalorder %s1381_s22, %s990_s25  ;;  %p997_p13 = scmp.lt.u32.totalorder %s995_s14, %s990_s25 }
  0x48   : > { %p999_p4 = scmp.lt.u32.totalorder %s990_s25, %s1381_s22 }
  0x49   : > { %p993_p1 = pnand %p991_p12, %p1343_p3  ;;  %p998_p2 = por %p997_p13, %p996_p10 }
  0x4b   : > { %p994_p5 = pneg %p993_p1  ;;  %p1000_p6 = por %p999_p4, %p998_p2 }
  0x4d   : > { %p1001_p7 = pnand %p1000_p6, %p994_p5 }
  0x4f   : > { %1004 = shalt.err (!%p1001_p7)
}
  0x50   : > { %s1005_s1 = scalar_lea.vmem %s1384_s7, 256  ;;  %s1208_s26 = smov [#allocation2]  }
  0x51   : > { %p1006_p8 = scmp.ne.s32.totalorder %s1384_s7, %s1005_s1  ;;  %s1010_s28 = sshll.u32 %s1208_s26, 4  ;;  %s1011_s28 = int_to_ptr.vmem [resolvable:$false] %s1010_s28 }
  0x52   : > { %s1012_s17 = scalar_lea.vmem %s1011_s28, 512  ;;  %p1013_p1 = scmp.lt.s32.totalorder %s1384_s7, %s1011_s28 }
  0x53   : > { %p1008_p9 = pnand %p1006_p8, %p1343_p3  ;;  %p1014_p11 = scmp.lt.s32.totalorder %s1012_s17, %s1005_s1 }
  0x55   : > { %p1009_p12 = pneg %p1008_p9  ;;  %p1015_p10 = por %p1014_p11, %p1013_p1 }
  0x57   : > { %p1016_p13 = pnand %p1015_p10, %p1009_p12 }
  0x59   : > { %1019 = shalt.err (!%p1016_p13)
}
  0x5a   : > { %s1868_s25 = smov 4   ;;  %s1869_s14 = smov 64  }
  0x5b   : > { %s1870_s15 = smov 128   ;;  %s1417_s1 = scalar_lea.hbm %s1831_s2, %s1318_s11 }
  0x5c   : > { %890 = dma.hbm_to_vmem [thread:$0]  (!%p1322_p0), %s1381_s22, 256, %s1384_s7, %s230_s16, %s1870_s15, %s1869_s14, %s1868_s25  }
  0x5d   : > { %s279_s28 = scalar_lea.vmem [#allocation7], %s1315_s10  ;;  %s1020_s20 = scalar_lea.hbm %s1417_s1, 256 }
  0x5e   : > { %s288_s17 = sshll.u32 %s279_s28, 4  ;;  %p1021_p11 = scmp.ne.s32.totalorder %s1417_s1, %s1020_s20  ;;  %s1420_s17 = int_to_ptr.vmem [resolvable:$true] %s288_s17 }
  0x5f   : > { %s1025_s22 = scalar_lea.hbm %s1831_s2, 512  ;;  %p1026_p4 = scmp.lt.u32.totalorder %s1417_s1, %s1831_s2 }
  0x60   : > { %p1023_p5 = pnand %p1021_p11, %p1343_p3  ;;  %p1027_p6 = scmp.lt.u32.totalorder %s1025_s22, %s1020_s20 }
  0x61   : > { %p1029_p8 = scmp.lt.u32.totalorder %s1020_s20, %s1417_s1 }
  0x62   : > { %p1024_p2 = pneg %p1023_p5  ;;  %p1028_p7 = por %p1027_p6, %p1026_p4 }
  0x64   : > { %p1030_p9 = por %p1029_p8, %p1028_p7 }
  0x66   : > { %p1031_p12 = pnand %p1030_p9, %p1024_p2 }
  0x68   : > { %1034 = shalt.err (!%p1031_p12)
}
  0x69   : > { %s1035_s26 = scalar_lea.vmem %s1420_s17, 256  ;;  %s1209_s23 = smov [#allocation7]  }
  0x6a   : > { %p1036_p1 = scmp.ne.s32.totalorder %s1420_s17, %s1035_s26  ;;  %s1040_s28 = sshll.u32 %s1209_s23, 4  ;;  %s1041_s28 = int_to_ptr.vmem [resolvable:$false] %s1040_s28 }
  0x6b   : > { %s1042_s7 = scalar_lea.vmem %s1041_s28, 512  ;;  %p1043_p11 = scmp.lt.s32.totalorder %s1420_s17, %s1041_s28 }
  0x6c   : > { %p1038_p10 = pnand %p1036_p1, %p1343_p3  ;;  %p1044_p5 = scmp.lt.s32.totalorder %s1042_s7, %s1035_s26 }
  0x6e   : > { %p1039_p13 = pneg %p1038_p10  ;;  %p1045_p4 = por %p1044_p5, %p1043_p11 }
  0x70   : > { %p1046_p6 = pnand %p1045_p4, %p1039_p13 }
  0x72   : > { %1049 = shalt.err (!%p1046_p6)
}
  0x73   : > { %896 = dma.hbm_to_vmem [thread:$0]  (!%p1322_p0), %s1417_s1, 256, %s1420_s17, %s1337_s27, %s1870_s15, %s1869_s14, %s1868_s25  }
  0x74   : > { %s1451_s0 = scalar_lea.hbm %s1832_s3, %s1318_s11  ;;  %s302_s16 = scalar_lea.vmem [#allocation8], %s1315_s10 }
  0x75   : > { %s311_s26 = sshll.u32 %s302_s16, 4  ;;  %s299_s23 = scalar_lea.sflag [#allocation9], %s1312_s9  ;;  %s1454_s26 = int_to_ptr.vmem [resolvable:$true] %s311_s26 }
  0x76   : > { %s1050_s28 = scalar_lea.hbm %s1451_s0, 256  ;;  %s1055_s17 = scalar_lea.hbm %s1832_s3, 512 }
  0x77   : > { %p1051_p2 = scmp.ne.s32.totalorder %s1451_s0, %s1050_s28  ;;  %p1056_p9 = scmp.lt.u32.totalorder %s1451_s0, %s1832_s3 }
  0x78   : > { %p1057_p12 = scmp.lt.u32.totalorder %s1055_s17, %s1050_s28  ;;  %p1059_p10 = scmp.lt.u32.totalorder %s1050_s28, %s1451_s0 }
  0x79   : > { %p1053_p7 = pnand %p1051_p2, %p1343_p3 }
  0x7a   : > { %p1058_p1 = por %p1057_p12, %p1056_p9 }
  0x7b   : > { %p1054_p8 = pneg %p1053_p7 }
  0x7c   : > { %p1060_p13 = por %p1059_p10, %p1058_p1 }
  0x7e   : > { %p1061_p11 = pnand %p1060_p13, %p1054_p8 }
  0x80   : > { %1064 = shalt.err (!%p1061_p11)
}
  0x81   : > { %s1065_s10 = scalar_lea.vmem %s1454_s26, 256  ;;  %s1210_s20 = smov [#allocation8]  }
  0x82   : > { %p1066_p5 = scmp.ne.s32.totalorder %s1454_s26, %s1065_s10  ;;  %s1070_s22 = sshll.u32 %s1210_s20, 4  ;;  %s1071_s22 = int_to_ptr.vmem [resolvable:$false] %s1070_s22 }
  0x83   : > { %s1072_s16 = scalar_lea.vmem %s1071_s22, 512  ;;  %p1073_p2 = scmp.lt.s32.totalorder %s1454_s26, %s1071_s22 }
  0x84   : > { %p1068_p4 = pnand %p1066_p5, %p1343_p3  ;;  %p1074_p7 = scmp.lt.s32.totalorder %s1072_s16, %s1065_s10 }
  0x86   : > { %p1069_p6 = pneg %p1068_p4  ;;  %p1075_p9 = por %p1074_p7, %p1073_p2 }
  0x88   : > { %p1076_p12 = pnand %p1075_p9, %p1069_p6 }
  0x8a   : > { %1079 = shalt.err (!%p1076_p12)
}
  0x8b   : > { %899 = dma.hbm_to_vmem [thread:$0]  (!%p1322_p0), %s1451_s0, 256, %s1454_s26, %s299_s23, %s1870_s15, %s1869_s14, %s1868_s25  }
  0x8c   : > { %p1871_p3 = scmp.ne.s32.totalorder %s1866_s13, 0 }
  0x8e   : > { %323 = sbr.rel (%p1871_p3) target bundleno = 233 (0xe9), region = 36 }
  0x95   : > { %s1486_s29 = sand.u32 1, %s1186_s19   ;;  %p1872_p8 = scmp.ne.s32.totalorder %s1858_s30, 0 }
  0x96   : > { %s863_s28 = sshll.u32 %s1486_s29, 4  ;;  %s326_s27 = scalar_lea.sflag [#allocation3], %s1486_s29 }
  0x97   : > { %s1490_s12 = scalar_lea.vmem [#allocation2], %s863_s28 }
  0x98   : > { %1161 = dma.done.wait (%p1872_p8), %s326_s27, 256  }
  0x99   : > { %1163 = vsyncadd (%p1872_p8), %s326_s27, 4294967040  ;;  %s334_s9 = sand.u32 1, %s1274_s24   ;;  %s1497_s25 = scalar_lea.vmem [#allocation5], %s863_s28 }
  0x9a   : > { %s335_s13 = scalar_lea.sflag [#allocation6], %s334_s9 }
  0x9b   : > { %1165 = dma.done.wait (%p1872_p8), %s335_s13, 512  }
  0x9c   : > { %1167 = vsyncadd (%p1872_p8), %s335_s13, 4294966784  ;;  %s1503_s14 = scalar_lea.vmem [#allocation7], %s863_s28  ;;  %s353_s15 = scalar_lea.sflag [#allocation9], %s1486_s29 }
  0x9d   : > { %s1506_s0 = scalar_lea.vmem [#allocation8], %s863_s28 }
  0x9e   : > { %1169 = dma.done.wait (%p1872_p8), %s353_s15, 256  }
  0x9f   : > { %1171 = vsyncadd (%p1872_p8), %s353_s15, 4294967040  ;;  %v407_v0 = vld [vmem:[%s1490_s12] sm:$0x1]  ;;  %v408_v1 = vld [vmem:[%s1490_s12 + $0x4] sm:$0x1]  ;;  %vm604_vm0 = vcmask 1041409  }
  0xa0   : > { %v409_v2 = vld [vmem:[%s1490_s12 + $0x8] sm:$0x1]  ;;  %v410_v3 = vld [vmem:[%s1490_s12 + $0xc] sm:$0x1]  ;;  %v411_v4 = vld [vmem:[%s1497_s25] sm:$0x1] }
  0xa1   : > { %v412_v5 = vld [vmem:[%s1497_s25 + $0x4] sm:$0x1]  ;;  %v413_v6 = vld [vmem:[%s1497_s25 + $0x8] sm:$0x1]  ;;  %v414_v7 = vld [vmem:[%s1497_s25 + $0xc] sm:$0x1] }
  0xa2   : > { %v415_v8 = vld [vmem:[%s1503_s14] sm:$0x1]  ;;  %v416_v9 = vld [vmem:[%s1503_s14 + $0x4] sm:$0x1]  ;;  %v417_v10 = vld [vmem:[%s1503_s14 + $0x8] sm:$0x1] }
  0xa3   : > { %v418_v11 = vld [vmem:[%s1503_s14 + $0xc] sm:$0x1]  ;;  %v423_v12 = vmul.f32 %v415_v8, %v407_v0  ;;  %v1524_v13 = vmul.f32 %v415_v8, %v411_v4  ;;  %v419_v14 = vld [vmem:[%s1506_s0] sm:$0x1]  ;;  %v420_v15 = vld [vmem:[%s1506_s0 + $0x4] sm:$0x1]  ;;  %v424_v17 = vmul.f32 %v416_v9, %v408_v1  ;;  %v425_v18 = vmul.f32 %v417_v10, %v409_v2 }
  0xa4   : > { %v421_v16 = vld [vmem:[%s1506_s0 + $0x8] sm:$0x1]  ;;  %v426_v19 = vmul.f32 %v418_v11, %v410_v3  ;;  %v1529_v20 = vmul.f32 %v416_v9, %v412_v5  ;;  %v422_v21 = vld [vmem:[%s1506_s0 + $0xc] sm:$0x1]  ;;  %v427_v22 = vmul.f32 %v419_v14, %v411_v4  ;;  %v428_v23 = vmul.f32 %v420_v15, %v412_v5  ;;  %v455_v25 = vld [vmem:[%s1490_s12 + $0x1] sm:$0x1] }
  0xa5   : > { %v429_v24 = vmul.f32 %v421_v16, %v413_v6  ;;  %v456_v26 = vld [vmem:[%s1490_s12 + $0x5] sm:$0x1]  ;;  %v1534_v27 = vmul.f32 %v419_v14, %v407_v0  ;;  %v430_v28 = vmul.f32 %v422_v21, %v414_v7  ;;  %v457_v29 = vld [vmem:[%s1490_s12 + $0x9] sm:$0x1]  ;;  %v458_v30 = vld [vmem:[%s1490_s12 + $0xd] sm:$0x1]  ;;  %v1539_v32 = vmul.f32 %v420_v15, %v408_v1 }
  0xa6   : > { %v459_v31 = vld [vmem:[%s1497_s25 + $0x1] sm:$0x1]  ;;  %v1541_v33 = vmul.f32 %v421_v16, %v409_v2  ;;  %v1543_v34 = vmul.f32 %v422_v21, %v410_v3  ;;  %v431_v35 = vadd.f32 %v427_v22, %v423_v12  ;;  %v432_v36 = vadd.f32 %v428_v23, %v424_v17  ;;  %v460_v38 = vld [vmem:[%s1497_s25 + $0x5] sm:$0x1]  ;;  %v1547_v39 = vld [vmem:[%s1497_s25 + $0x9] sm:$0x1] }
  0xa7   : > { %v433_v37 = vadd.f32 %v429_v24, %v425_v18  ;;  %v1550_v40 = vld [vmem:[%s1497_s25 + $0xd] sm:$0x1]  ;;  %v1552_v41 = vmul.f32 %v417_v10, %v413_v6  ;;  %v434_v42 = vadd.f32 %v430_v28, %v426_v19  ;;  %v463_v43 = vld [vmem:[%s1503_s14 + $0x1] sm:$0x1]  ;;  %v464_v44 = vld [vmem:[%s1503_s14 + $0x5] sm:$0x1]  ;;  %v1559_v46 = vmul.f32 %v418_v11, %v414_v7 }
  0xa8   : > { %v1557_v45 = vld [vmem:[%s1503_s14 + $0x9] sm:$0x1]  ;;  %v447_v47 = vsub.f32 %v1534_v27, %v1524_v13  ;;  %v466_v49 = vld [vmem:[%s1503_s14 + $0xd] sm:$0x1]  ;;  %v467_v50 = vld [vmem:[%s1506_s0 + $0x1] sm:$0x1]  ;;  %v471_v52 = vmul.f32 %v463_v43, %v455_v25  ;;  %v472_v53 = vmul.f32 %v464_v44, %v456_v26  ;;  %v491_v19 = vmul.f32 %v463_v43, %v459_v31 }
  0xa9   : > { %v468_v51 = vld [vmem:[%s1506_s0 + $0x5] sm:$0x1]  ;;  %v473_v54 = vmul.f32 %v1557_v45, %v457_v29  ;;  %v469_v56 = vld [vmem:[%s1506_s0 + $0x9] sm:$0x1]  ;;  %v470_v57 = vld [vmem:[%s1506_s0 + $0xd] sm:$0x1]  ;;  %v474_v58 = vmul.f32 %v466_v49, %v458_v30  ;;  %v475_v59 = vmul.f32 %v467_v50, %v459_v31  ;;  %v487_v4 = vmul.f32 %v467_v50, %v455_v25 }
  0xaa   : > { %v476_v60 = vmul.f32 %v468_v51, %v460_v38  ;;  %v1574_v61 = vld [vmem:[%s1490_s12 + $0x2] sm:$0x1]  ;;  %v477_v63 = vmul.f32 %v469_v56, %v1547_v39  ;;  %v478_v0 = vmul.f32 %v470_v57, %v1550_v40  ;;  %v1581_v1 = vld [vmem:[%s1490_s12 + $0x6] sm:$0x1]  ;;  %v1584_v2 = vld [vmem:[%s1490_s12 + $0xa] sm:$0x1]  ;;  %v1589_v5 = vmul.f32 %v468_v51, %v456_v26 }
  0xab   : > { %v1587_v3 = vld [vmem:[%s1490_s12 + $0xe] sm:$0x1]  ;;  %v479_v6 = vadd.f32 %v475_v59, %v471_v52  ;;  %v1592_v8 = vld [vmem:[%s1497_s25 + $0x2] sm:$0x1]  ;;  %v1595_v9 = vld [vmem:[%s1497_s25 + $0x6] sm:$0x1]  ;;  %v1600_v11 = vmul.f32 %v469_v56, %v457_v29  ;;  %v1602_v12 = vmul.f32 %v470_v57, %v458_v30  ;;  %v1613_v21 = vmul.f32 %v464_v44, %v460_v38 }
  0xac   : > { %v480_v7 = vadd.f32 %v476_v60, %v472_v53  ;;  %v1598_v10 = vld [vmem:[%s1497_s25 + $0xa] sm:$0x1]  ;;  %v481_v14 = vadd.f32 %v477_v63, %v473_v54  ;;  %v482_v15 = vadd.f32 %v478_v0, %v474_v58  ;;  %v1605_v16 = vld [vmem:[%s1497_s25 + $0xe] sm:$0x1]  ;;  %v1608_v17 = vld [vmem:[%s1503_s14 + $0x2] sm:$0x1]  ;;  %v493_v59 = vmul.f32 %v1557_v45, %v1547_v39 }
  0xad   : > { %v1611_v18 = vld [vmem:[%s1503_s14 + $0x6] sm:$0x1]  ;;  %v483_v22 = vadd.f32 %v479_v6, %v431_v35  ;;  %v1616_v24 = vld [vmem:[%s1503_s14 + $0xa] sm:$0x1]  ;;  %v1619_v25 = vld [vmem:[%s1503_s14 + $0xe] sm:$0x1]  ;;  %v519_v28 = vmul.f32 %v1608_v17, %v1574_v61  ;;  %v494_v60 = vmul.f32 %v466_v49, %v1550_v40  ;;  %v495_v63 = vsub.f32 %v487_v4, %v491_v19 }
  0xae   : > { %v484_v23 = vadd.f32 %v480_v7, %v432_v36  ;;  %v515_v26 = vld [vmem:[%s1506_s0 + $0x2] sm:$0x1]  ;;  %v520_v29 = vmul.f32 %v1611_v18, %v1581_v1  ;;  %v485_v30 = vadd.f32 %v481_v14, %v433_v37  ;;  %v486_v31 = vadd.f32 %v482_v15, %v434_v42  ;;  %v516_v35 = vld [vmem:[%s1506_s0 + $0x6] sm:$0x1]  ;;  %v517_v36 = vld [vmem:[%s1506_s0 + $0xa] sm:$0x1] }
  0xaf   : > { %v518_v38 = vld [vmem:[%s1506_s0 + $0xe] sm:$0x1]  ;;  %v521_v43 = vmul.f32 %v1616_v24, %v1584_v2  ;;  %v522_v44 = vmul.f32 %v1619_v25, %v1587_v3  ;;  %v523_v50 = vmul.f32 %v515_v26, %v1592_v8  ;;  %v524_v51 = vmul.f32 %v516_v35, %v1595_v9  ;;  %v1638_v42 = vld [vmem:[%s1490_s12 + $0x3] sm:$0x1]  ;;  %v1641_v53 = vld [vmem:[%s1490_s12 + $0x7] sm:$0x1] }
  0xb0   : > { %v525_v52 = vmul.f32 %v517_v36, %v1598_v10  ;;  %v526_v37 = vmul.f32 %v518_v38, %v1605_v16  ;;  %v1644_v54 = vld [vmem:[%s1490_s12 + $0xb] sm:$0x1]  ;;  %v1647_v56 = vld [vmem:[%s1490_s12 + $0xf] sm:$0x1]  ;;  %v1650_v57 = vld [vmem:[%s1497_s25 + $0x3] sm:$0x1]  ;;  %v496_v0 = vsub.f32 %v1589_v5, %v1613_v21  ;;  %v497_v4 = vsub.f32 %v1600_v11, %v493_v59 }
  0xb1   : > { %v1653_v58 = vld [vmem:[%s1497_s25 + $0x7] sm:$0x1]  ;;  %v527_v6 = vadd.f32 %v523_v50, %v519_v28  ;;  %v528_v7 = vadd.f32 %v524_v51, %v520_v29  ;;  %v1661_v62 = vld [vmem:[%s1497_s25 + $0xb] sm:$0x1]  ;;  %v1664_v55 = vld [vmem:[%s1497_s25 + $0xf] sm:$0x1]  ;;  %v498_v5 = vsub.f32 %v1602_v12, %v494_v60  ;;  %v499_v19 = vadd.f32 %v495_v63, %v447_v47 }
  0xb2   : > { %v529_v14 = vadd.f32 %v525_v52, %v521_v43  ;;  %v530_v15 = vadd.f32 %v526_v37, %v522_v44  ;;  %1873 = vst [vmem:[#allocation23_spill] sm:$0xff] %v1664_v55  ;;  %v1667_v48 = vld [vmem:[%s1503_s14 + $0x3] sm:$0x1]  ;;  %v1670_v39 = vld [vmem:[%s1503_s14 + $0x7] sm:$0x1]  ;;  %vm607_vm1 = vcmask 1042434   ;;  %v1877_v59 = vsub.f32 %v1541_v33, %v1552_v41 }
  0xb3   : > { %v1673_v40 = vld [vmem:[%s1503_s14 + $0xb] sm:$0x1]  ;;  %v1676_v45 = vld [vmem:[%s1503_s14 + $0xf] sm:$0x1]  ;;  %v567_v49 = vmul.f32 %v1667_v48, %v1638_v42  ;;  %v531_v21 = vadd.f32 %v527_v6, %v483_v22  ;;  %v532_v28 = vadd.f32 %v528_v7, %v484_v23  ;;  %v563_v44 = vld [vmem:[%s1506_s0 + $0x3] sm:$0x1]  ;;  %v568_v37 = vmul.f32 %v1670_v39, %v1641_v53 }
  0xb4   : > { %1874 = vst [vmem:[#allocation24_spill] sm:$0xff] %v1673_v40  ;;  %1875 = vst [vmem:[#allocation25_spill] sm:$0xff] %v1676_v45  ;;  %v533_v29 = vadd.f32 %v529_v14, %v485_v30  ;;  %v534_v43 = vadd.f32 %v530_v15, %v486_v31  ;;  %v564_v50 = vld [vmem:[%s1506_s0 + $0x7] sm:$0x1]  ;;  %v565_v51 = vld [vmem:[%s1506_s0 + $0xb] sm:$0x1]  ;;  %v569_v11 = vmul.f32 %v1673_v40, %v1644_v54 }
  0xb5   : > { %v566_v52 = vld [vmem:[%s1506_s0 + $0xf] sm:$0x1]  ;;  %v570_v13 = vmul.f32 %v1676_v45, %v1647_v56  ;;  %v571_v27 = vmul.f32 %v563_v44, %v1650_v57  ;;  %vm610_vm2 = vcmask 1043459   ;;  %s867_s24 = sshll.u32 %s1486_s29, 2  ;;  %v572_v47 = vmul.f32 %v564_v50, %v1653_v58  ;;  %s871_s23 = sshll.u32 %s1194_s21, 6 }
  0xb6   : > { %v573_v12 = vmul.f32 %v565_v51, %v1661_v62  ;;  %v574_v22 = vmul.f32 %v566_v52, %v1664_v55  ;;  %v1876_v23 = vsub.f32 %v1539_v32, %v1529_v20  ;;  %v501_v60 = vadd.f32 %v497_v4, %v1877_v59  ;;  %s395_s30 = scalar_lea.vmem [#allocation10], %s867_s24  ;;  %s1739_s11 = scalar_lea.hbm %s1833_s4, %s871_s23 }
  0xb7   : > { %v575_v31 = vadd.f32 %v571_v27, %v567_v49  ;;  %v1878_v63 = vsub.f32 %v1543_v34, %v1559_v46  ;;  %v535_v7 = vmul.f32 %v515_v26, %v1574_v61  ;;  %v576_v14 = vadd.f32 %v572_v47, %v568_v37  ;;  %s647_s26 = sshll.u32 %s395_s30, 4  ;;  %s627_s7 = scalar_lea.sflag [#allocation4], %s1486_s29  ;;  %s1730_s26 = int_to_ptr.vmem [resolvable:$true] %s647_s26 }
  0xb8   : > { %v500_v30 = vadd.f32 %v496_v0, %v1876_v23  ;;  %v577_v15 = vadd.f32 %v573_v12, %v569_v11  ;;  %v578_v45 = vadd.f32 %v574_v22, %v570_v13  ;;  %v536_v55 = vmul.f32 %v516_v35, %v1581_v1  ;;  %s1080_s10 = scalar_lea.vmem %s1730_s26, 64  ;;  %p1882_p1 = scmp.ne.s32.totalorder %s1859_s6, 0 }
  0xb9   : > { %v502_v6 = vadd.f32 %v498_v5, %v1878_v63  ;;  %v579_v40 = vadd.f32 %v575_v31, %v531_v21  ;;  %v537_v20 = vmul.f32 %v517_v36, %v1584_v2  ;;  %v538_v32 = vmul.f32 %v518_v38, %v1587_v3  ;;  %v1880_v4 = vld [vmem:[#allocation23_spill] sm:$0xff]  ;;  %p1081_p0 = scmp.ne.s32.totalorder %s1730_s26, %s1080_s10  ;;  %s1211_s20 = smov [#allocation10]  }
  0xba   : > { %v539_v33 = vmul.f32 %v1608_v17, %v1592_v8  ;;  %v580_v41 = vadd.f32 %v576_v14, %v532_v28  ;;  %v581_v34 = vadd.f32 %v577_v15, %v533_v29  ;;  %v582_v46 = vadd.f32 %v578_v45, %v534_v43  ;;  %s1084_s22 = sshll.u32 %s1211_s20, 4  ;;  %s1085_s22 = int_to_ptr.vmem [resolvable:$false] %s1084_s22 }
  0xbb   : > { %v540_v61 = vmul.f32 %v1611_v18, %v1595_v9  ;;  %v541_v26 = vmul.f32 %v1616_v24, %v1598_v10  ;;  %v542_v1 = vmul.f32 %v1619_v25, %v1605_v16  ;;  %v583_v2 = vmul.f32 %v563_v44, %v1638_v42  ;;  %v1881_v5 = vld [vmem:[#allocation25_spill] sm:$0xff]  ;;  %p1082_p10 = pnand %p1081_p0, %p1882_p1  ;;  %s1086_s16 = scalar_lea.vmem %s1085_s22, 128 }
  0xbc   : > { %v543_v35 = vsub.f32 %v535_v7, %v539_v33  ;;  %v603_v3 = vrot.slane %v580_v41, 7  ;;  %v606_v36 = vrot.slane %v581_v34, 6  ;;  %v609_v38 = vrot.slane %v582_v46, 5  ;;  %p1087_p11 = scmp.lt.s32.totalorder %s1730_s26, %s1085_s22  ;;  %p1088_p5 = scmp.lt.s32.totalorder %s1086_s16, %s1080_s10 }
  0xbd   : > { %v544_v8 = vsub.f32 %v536_v55, %v540_v61  ;;  %v545_v17 = vsub.f32 %v537_v20, %v541_v26  ;;  %v546_v9 = vsub.f32 %v538_v32, %v542_v1  ;;  %v584_v10 = vmul.f32 %v564_v50, %v1641_v53  ;;  %p1083_p13 = pneg %p1082_p10 }
  0xbe   : > { %v547_v18 = vadd.f32 %v543_v35, %v499_v19  ;;  %v605_v24 = vsel %vm604_vm0, %v603_v3, %v579_v40  ;;  %v585_v25 = vmul.f32 %v565_v51, %v1644_v54  ;;  %v586_v42 = vmul.f32 %v566_v52, %v1647_v56  ;;  %v1879_v40 = vld [vmem:[#allocation24_spill] sm:$0xff]  ;;  %p1089_p4 = por %p1088_p5, %p1087_p11 }
  0xbf   : > { %v548_v16 = vadd.f32 %v544_v8, %v500_v30  ;;  %v608_v0 = vsel %vm607_vm1, %v606_v36, %v605_v24  ;;  %v549_v55 = vadd.f32 %v545_v17, %v501_v60  ;;  %v550_v45 = vadd.f32 %v546_v9, %v502_v6 }
  0xc0   : > { %v587_v53 = vmul.f32 %v1667_v48, %v1650_v57  ;;  %v611_v54 = vsel %vm610_vm2, %v609_v38, %v608_v0  ;;  %v588_v56 = vmul.f32 %v1670_v39, %v1653_v58  ;;  %v589_v49 = vmul.f32 %v1879_v40, %v1661_v62  ;;  %p1090_p6 = pnand %p1089_p4, %p1083_p13 }
  0xc1   : > { %v590_v19 = vmul.f32 %v1881_v5, %v1880_v4  ;;  %613 = vst [vmem:[%s395_s30] sm:$0xf] %v611_v54 }
  0xc2   : > { %v591_v48 = vsub.f32 %v583_v2, %v587_v53  ;;  %v592_v57 = vsub.f32 %v584_v10, %v588_v56  ;;  %v593_v21 = vsub.f32 %v585_v25, %v589_v49 }
  0xc3   : > { %v594_v28 = vsub.f32 %v586_v42, %v590_v19 }
  0xc4   : > { %1093 = shalt.err (!%p1090_p6)
}
  0xc5   : > { %s1094_s28 = scalar_lea.hbm %s1739_s11, 64  ;;  %s1098_s9 = scalar_lea.hbm %s1833_s4, 128 }
  0xc6   : > { %p1095_p2 = scmp.ne.s32.totalorder %s1739_s11, %s1094_s28  ;;  %p1099_p12 = scmp.lt.u32.totalorder %s1739_s11, %s1833_s4 }
  0xc7   : > { %p1100_p3 = scmp.lt.u32.totalorder %s1098_s9, %s1094_s28  ;;  %p1102_p0 = scmp.lt.u32.totalorder %s1094_s28, %s1739_s11 }
  0xc8   : > { %p1096_p7 = pnand %p1095_p2, %p1882_p1 }
  0xc9   : > { %p1101_p8 = por %p1100_p3, %p1099_p12 }
  0xca   : > { %p1097_p9 = pneg %p1096_p7 }
  0xcb   : > { %p1103_p10 = por %p1102_p0, %p1101_p8 }
  0xcd   : > { %p1104_p13 = pnand %p1103_p10, %p1097_p9 }
  0xcf   : > { %1107 = shalt.err (!%p1104_p13)
}
  0xd0   : > { %883 = dma.vmem_to_hbm [thread:$0]  (%p1882_p1), %s1730_s26, 64, %s1739_s11, %s627_s7   ;;  %v595_v62 = vadd.f32 %v591_v48, %v547_v18  ;;  %v596_v58 = vadd.f32 %v592_v57, %v548_v16  ;;  %v597_v39 = vadd.f32 %v593_v21, %v549_v55  ;;  %v598_v29 = vadd.f32 %v594_v28, %v550_v45 }
  0xd1   : > { %s402_s14 = scalar_lea.vmem [#allocation11], %s867_s24  ;;  %s1781_s26 = scalar_lea.hbm %s1834_s5, %s871_s23 }
  0xd2   : > { %s662_s15 = sshll.u32 %s402_s14, 4  ;;  %v618_v43 = vrot.slane %v596_v58, 7  ;;  %v620_v44 = vrot.slane %v597_v39, 6  ;;  %v622_v50 = vrot.slane %v598_v29, 5  ;;  %s632_s24 = scalar_lea.sflag [#allocation12], %s1486_s29  ;;  %s1773_s15 = int_to_ptr.vmem [resolvable:$true] %s662_s15 }
  0xd3   : > { %s1108_s1 = scalar_lea.vmem %s1773_s15, 64  ;;  %s1212_s17 = smov [#allocation11]  }
  0xd4   : > { %v619_v51 = vsel %vm604_vm0, %v618_v43, %v595_v62  ;;  %p1109_p11 = scmp.ne.s32.totalorder %s1773_s15, %s1108_s1  ;;  %s1112_s11 = sshll.u32 %s1212_s17, 4  ;;  %s1113_s11 = int_to_ptr.vmem [resolvable:$false] %s1112_s11 }
  0xd5   : > { %v621_v52 = vsel %vm607_vm1, %v620_v44, %v619_v51  ;;  %s1114_s7 = scalar_lea.vmem %s1113_s11, 128  ;;  %p1115_p6 = scmp.lt.s32.totalorder %s1773_s15, %s1113_s11 }
  0xd6   : > { %v623_v37 = vsel %vm610_vm2, %v622_v50, %v621_v52  ;;  %p1110_p5 = pnand %p1109_p11, %p1882_p1  ;;  %p1116_p2 = scmp.lt.s32.totalorder %s1114_s7, %s1108_s1 }
  0xd7   : > { %625 = vst [vmem:[%s402_s14] sm:$0xf] %v623_v37 }
  0xd8   : > { %p1111_p4 = pneg %p1110_p5  ;;  %p1117_p7 = por %p1116_p2, %p1115_p6 }
  0xda   : > { %p1118_p9 = pnand %p1117_p7, %p1111_p4 }
  0xdc   : > { %1121 = shalt.err (!%p1118_p9)
}
  0xdd   : > { %s1122_s21 = scalar_lea.hbm %s1781_s26, 64  ;;  %s1126_s10 = scalar_lea.hbm %s1834_s5, 128 }
  0xde   : > { %p1123_p12 = scmp.ne.s32.totalorder %s1781_s26, %s1122_s21  ;;  %p1127_p0 = scmp.lt.u32.totalorder %s1781_s26, %s1834_s5 }
  0xdf   : > { %p1128_p10 = scmp.lt.u32.totalorder %s1126_s10, %s1122_s21  ;;  %p1130_p11 = scmp.lt.u32.totalorder %s1122_s21, %s1781_s26 }
  0xe0   : > { %p1124_p3 = pnand %p1123_p12, %p1882_p1 }
  0xe1   : > { %p1129_p13 = por %p1128_p10, %p1127_p0 }
  0xe2   : > { %p1125_p8 = pneg %p1124_p3 }
  0xe3   : > { %p1131_p5 = por %p1130_p11, %p1129_p13 }
  0xe5   : > { %p1132_p4 = pnand %p1131_p5, %p1125_p8 }
  0xe7   : > { %1135 = shalt.err (!%p1132_p4)
}
  0xe8   : > { %884 = dma.vmem_to_hbm [thread:$0]  (%p1882_p1), %s1773_s15, 64, %s1781_s26, %s632_s24  }
  0xe9 PF: > { %s1883_s16 = sld [smem:[#allocation20_spill]]  ;;  %s674_s28 = sand.u32 1, %s1182_s18  }
  0xea   : > { %p1884_p6 = scmp.ne.s32.totalorder %s1861_s8, 0  ;;  %s675_s27 = scalar_lea.sflag [#allocation4], %s674_s28 }
  0xef   : > { %p1885_p2 = scmp.ge.s32.totalorder %s1883_s16, 2 }
  0xf1   : > { %p901_p7 = pnand %p1885_p2, %p1884_p6 }
  0xf3   : > { %1173 = dma.done.wait (!%p901_p7), %s675_s27, 64  }
  0xf4   : > { %1175 = vsyncadd (!%p901_p7), %s675_s27, 4294967232  ;;  %s684_s12 = scalar_lea.sflag [#allocation12], %s674_s28 }
  0xf5   : > { %1177 = dma.done.wait (!%p901_p7), %s684_s12, 64  }
  0xf6   : > { %1179 = vsyncadd (!%p901_p7), %s684_s12, 4294967232  ;;  %s31_s23 = sadd.s32 1, %s1883_s16   ;;  %s1886_s6 = sld [smem:[#allocation18_spill]] }
  0xf7   : > { %p28_p9 = scmp.ge.s32.totalorder %s31_s23, 4   ;;  %s1887_s20 = sld [smem:[#allocation22_spill]] }
  0xf8   : > { %s1888_s21 = sld [smem:[#allocation19_spill]]  ;;  %s1889_s22 = sld [smem:[#allocation21_spill]] }
  0xf9   : > { %s1890_s18 = smov %s1186_s19  ;;  %30 = sbr.rel (!%p28_p9) target bundleno = 15 (0xf), region = 135 }
  0xfc   : > { %s1891_s19 = smov %s1886_s6 }
 0x100   :  { %689 = vsyncpa [#allocation3], 1 }
 0x101   :  { %691 = vsyncpa [#allocation3 + $0x1], 1 }
 0x102   :  { %692 = vsyncpa [#allocation6], 1 }
 0x103   :  { %694 = vsyncpa [#allocation6 + $0x1], 1 }
 0x104   :  { %695 = vsyncpa [#allocation9], 1 }
 0x105   :  { %697 = vsyncpa [#allocation9 + $0x1], 1 }
 0x106   :  { %698 = vsyncpa [#allocation4], 1 }
 0x107   :  { %700 = vsyncpa [#allocation4 + $0x1], 1 }
 0x108   :  { %701 = vsyncpa [#allocation12], 1 }
 0x109   :  { %703 = vsyncpa [#allocation12 + $0x1], 1 }

</bundles_post_ra>
